<compile_context>
chip_gen: v6e
topology: v6e:2x2x1
jax: 0.10.0
libtpu: 0.0.40
codegen_flags: <defaults>
</compile_context>

<pallas_src>
import functools

import jax
import jax.numpy as jnp
from jax.experimental import pallas as pl
from jax.experimental.pallas import tpu as pltpu


# ----------------------------------------------------------------------------- fused head kernel
def _lane_exist_kernel(x_ref, w1_ref, b1_ref, w2_ref, b2_ref, o_ref, *, predict):
    # x_ref : (TN, 4, F)   four avg-pool taps per sample, F in NCHW-flatten order
    # w1_ref: (F, 128)     linear1 weight (stored transposed: in x out)
    # b1_ref: (1, 128)
    # w2_ref: (128, NOUT)  linear2 weight (in x out)
    # b2_ref: (1, NOUT)
    # o_ref : (TN, NOUT)
    x = x_ref[...]
    # AvgPool2d(2,2) + flatten(start_dim=1): mean of the 4 window taps (VPU work).
    pooled = 0.25 * (x[:, 0, :] + x[:, 1, :] + x[:, 2, :] + x[:, 3, :])
    # linear1 + ReLU (single MXU contraction over F, f32 accumulation, lane-dense 128 output).
    h = jnp.dot(pooled, w1_ref[...], preferred_element_type=jnp.float32) + b1_ref[0][None, :]
    h = jnp.maximum(h, 0.0)
    # linear2.
    out = jnp.dot(h, w2_ref[...], preferred_element_type=jnp.float32) + b2_ref[0][None, :]
    if predict:  # only taken when predict=True (reference default is False)
        out = jax.nn.sigmoid(out)
    o_ref[...] = out.astype(o_ref.dtype)


# ----------------------------------------------------------------------------- wrapper
def lane_exist_vgg_forward(x_nchw, params, *, predict=False):
    """x_nchw: (N, C, H, W) float32. Returns (N, num_output), matching LaneExistVgg.forward."""
    x = x_nchw.astype(jnp.float32)
    N, C, H, W = x.shape
    H2, W2 = H // 2, W // 2
    F = C * H2 * W2

    w1, b1, w2, b2 = params["w1"], params["b1"], params["w2"], params["b2"]
    assert w1.shape[0] == F, (w1.shape, F)
    hidden = w1.shape[1]          # 128
    nout = w2.shape[1]

    # Layout-only glue: expose the 2x2 pool taps as axis 1 and put the flattened
    # (c, h2, w2) index — identical to PyTorch's flatten order — on the last axis.
    # x_taps[n, th*2+tw, c*H2*W2 + h2*W2 + w2] = x[n, c, 2*h2+th, 2*w2+tw]
    x_taps = (x.reshape(N, C, H2, 2, W2, 2)
                .transpose(0, 3, 5, 1, 2, 4)
                .reshape(N, 4, F))

    tn = min(N, 128)              # batch tile (full batch for small N)
    grid = (pl.cdiv(N, tn),)
    kernel = functools.partial(_lane_exist_kernel, predict=predict)

    out = pl.pallas_call(
        kernel,
        out_shape=jax.ShapeDtypeStruct((N, nout), jnp.float32),
        grid=grid,
        in_specs=[
            pl.BlockSpec((tn, 4, F), lambda i: (i, 0, 0)),
            pl.BlockSpec((F, hidden), lambda i: (0, 0)),
            pl.BlockSpec((1, hidden), lambda i: (0, 0)),
            pl.BlockSpec((hidden, nout), lambda i: (0, 0)),
            pl.BlockSpec((1, nout), lambda i: (0, 0)),
        ],
        out_specs=pl.BlockSpec((tn, nout), lambda i: (i, 0)),
        compiler_params=pltpu.CompilerParams(dimension_semantics=("parallel",)),
    )(x_taps, w1, b1.reshape(1, hidden), w2, b2.reshape(1, nout))
    return out


# ----------------------------------------------------------------------------- params
def init_params(key, flattened_size, num_output, hidden=128):
    """Deterministic synthetic Linear params (stored transposed as (in, out) for lane-dense matmul)."""
    k1, k2, k3, k4 = jax.random.split(key, 4)
    s1 = 1.0 / jnp.sqrt(jnp.float32(flattened_size))
    s2 = 1.0 / jnp.sqrt(jnp.float32(hidden))
    w1 = jax.random.uniform(k1, (flattened_size, hidden), jnp.float32, -s1, s1)
    b1 = jax.random.uniform(k2, (hidden,), jnp.float32, -s1, s1)
    w2 = jax.random.uniform(k3, (hidden, num_output), jnp.float32, -s2, s2)
    b2 = jax.random.uniform(k4, (num_output,), jnp.float32, -s2, s2)
    return {"w1": w1, "b1": b1, "w2": w2, "b2": b2}


if __name__ == "__main__":
    key = jax.random.PRNGKey(0)
    kx, kp = jax.random.split(key)

    # Small shapes consistent with the module: batch=2, C=4, 16x16 spatial
    # -> AvgPool2d(2,2) gives 4x8x8 -> flattened_size = 256; num_output = 4.
    N, C, H, W = 2, 4, 16, 16
    num_output = 4
    flattened_size = C * (H // 2) * (W // 2)

    x = jax.random.normal(kx, (N, C, H, W), jnp.float32)
    params = init_params(kp, flattened_size, num_output)

    out = jax.block_until_ready(lane_exist_vgg_forward(x, params, predict=False))
    assert out.shape == (N, num_output), out.shape
    assert bool(jnp.all(jnp.isfinite(out)))

    # Pure-JAX reference of the PyTorch forward (predict=False).
    pooled = x.reshape(N, C, H // 2, 2, W // 2, 2).mean(axis=(3, 5)).reshape(N, -1)
    ref = jnp.maximum(pooled @ params["w1"] + params["b1"], 0.0) @ params["w2"] + params["b2"]
    assert bool(jnp.allclose(out, ref, atol=1e-4, rtol=1e-4)), (out, ref)

    print("KERNEL_OK")
</pallas_src>

<mosaic_0001>
module attributes {stable_mosaic.version = 11 : i64} {
  func.func @_lane_exist_kernel(%arg0: i32, %arg1: memref<2x4x256xf32, #tpu.memory_space<vmem>>, %arg2: memref<256x128xf32, #tpu.memory_space<vmem>>, %arg3: memref<1x128xf32, #tpu.memory_space<vmem>>, %arg4: memref<128x4xf32, #tpu.memory_space<vmem>>, %arg5: memref<1x4xf32, #tpu.memory_space<vmem>>, %arg6: memref<2x4xf32, #tpu.memory_space<vmem>>) attributes {dimension_semantics = [#tpu.dimension_semantics<parallel>], iteration_bounds = array<i64: 1>, scalar_prefetch = 0 : i64, scratch_operands = 0 : i64, tpu.core_type = #tpu.core_type<tc>, window_params = [{transform_indices = @transform_0, window_bounds = array<i64: 2, 4, 256>}, {pipeline_mode = #tpu.pipeline_mode<synchronous>, transform_indices = @transform_1, window_bounds = array<i64: 256, 128>}, {pipeline_mode = #tpu.pipeline_mode<synchronous>, transform_indices = @transform_2, window_bounds = array<i64: 1, 128>}, {pipeline_mode = #tpu.pipeline_mode<synchronous>, transform_indices = @transform_3, window_bounds = array<i64: 128, 4>}, {pipeline_mode = #tpu.pipeline_mode<synchronous>, transform_indices = @transform_4, window_bounds = array<i64: 1, 4>}, {transform_indices = @transform_5, window_bounds = array<i64: 2, 4>}]} {
    %c0 = arith.constant 0 : index
    %c0_0 = arith.constant 0 : index
    %c0_1 = arith.constant 0 : index
    %0 = vector.load %arg1[%c0, %c0_0, %c0_1] : memref<2x4x256xf32, #tpu.memory_space<vmem>>, vector<2x4x256xf32>
    %1 = vector.extract_strided_slice %0 {offsets = [0, 0, 0], sizes = [2, 1, 256], strides = [1, 1, 1]} : vector<2x4x256xf32> to vector<2x1x256xf32>
    %2 = vector.shape_cast %1 : vector<2x1x256xf32> to vector<2x256xf32>
    %3 = vector.extract_strided_slice %0 {offsets = [0, 1, 0], sizes = [2, 1, 256], strides = [1, 1, 1]} : vector<2x4x256xf32> to vector<2x1x256xf32>
    %4 = vector.shape_cast %3 : vector<2x1x256xf32> to vector<2x256xf32>
    %5 = arith.addf %2, %4 : vector<2x256xf32>
    %6 = vector.extract_strided_slice %0 {offsets = [0, 2, 0], sizes = [2, 1, 256], strides = [1, 1, 1]} : vector<2x4x256xf32> to vector<2x1x256xf32>
    %7 = vector.shape_cast %6 : vector<2x1x256xf32> to vector<2x256xf32>
    %8 = arith.addf %5, %7 : vector<2x256xf32>
    %9 = vector.extract_strided_slice %0 {offsets = [0, 3, 0], sizes = [2, 1, 256], strides = [1, 1, 1]} : vector<2x4x256xf32> to vector<2x1x256xf32>
    %10 = vector.shape_cast %9 : vector<2x1x256xf32> to vector<2x256xf32>
    %11 = arith.addf %8, %10 : vector<2x256xf32>
    %cst = arith.constant 2.500000e-01 : f32
    %12 = vector.broadcast %cst : f32 to vector<2x256xf32>
    %13 = arith.mulf %12, %11 : vector<2x256xf32>
    %c0_2 = arith.constant 0 : index
    %c0_3 = arith.constant 0 : index
    %14 = vector.load %arg2[%c0_2, %c0_3] : memref<256x128xf32, #tpu.memory_space<vmem>>, vector<256x128xf32>
    %cst_4 = arith.constant dense<0.000000e+00> : vector<2x128xf32>
    %15 = tpu.matmul %13, %14, %cst_4 {dimension_numbers = #tpu.dot_dimension_numbers<[1], [0], [0], [1], [0, 0, 1, 1], [], []>} : vector<2x256xf32>, vector<256x128xf32>, vector<2x128xf32> -> vector<2x128xf32>
    %c0_5 = arith.constant 0 : index
    %c0_6 = arith.constant 0 : index
    %16 = vector.load %arg3[%c0_5, %c0_6] : memref<1x128xf32, #tpu.memory_space<vmem>>, vector<1x128xf32>
    %17 = vector.shape_cast %16 : vector<1x128xf32> to vector<128xf32>
    %18 = vector.shape_cast %17 : vector<128xf32> to vector<1x128xf32>
    %19 = vector.broadcast %18 : vector<1x128xf32> to vector<2x128xf32>
    %20 = arith.addf %15, %19 : vector<2x128xf32>
    %cst_7 = arith.constant 0.000000e+00 : f32
    %21 = vector.broadcast %cst_7 : f32 to vector<2x128xf32>
    %22 = arith.maximumf %20, %21 : vector<2x128xf32>
    %c0_8 = arith.constant 0 : index
    %c0_9 = arith.constant 0 : index
    %23 = vector.load %arg4[%c0_8, %c0_9] : memref<128x4xf32, #tpu.memory_space<vmem>>, vector<128x4xf32>
    %cst_10 = arith.constant dense<0.000000e+00> : vector<2x4xf32>
    %24 = tpu.matmul %22, %23, %cst_10 {dimension_numbers = #tpu.dot_dimension_numbers<[1], [0], [0], [1], [0, 0, 1, 1], [], []>} : vector<2x128xf32>, vector<128x4xf32>, vector<2x4xf32> -> vector<2x4xf32>
    %c0_11 = arith.constant 0 : index
    %c0_12 = arith.constant 0 : index
    %25 = vector.load %arg5[%c0_11, %c0_12] : memref<1x4xf32, #tpu.memory_space<vmem>>, vector<1x4xf32>
    %26 = vector.shape_cast %25 : vector<1x4xf32> to vector<4xf32>
    %27 = vector.shape_cast %26 : vector<4xf32> to vector<1x4xf32>
    %28 = vector.broadcast %27 : vector<1x4xf32> to vector<2x4xf32>
    %29 = arith.addf %24, %28 : vector<2x4xf32>
    %c0_13 = arith.constant 0 : index
    %c0_14 = arith.constant 0 : index
    %30 = vector.load %arg6[%c0_13, %c0_14] : memref<2x4xf32, #tpu.memory_space<vmem>>, vector<2x4xf32>
    tpu.vector_store %arg6[%c0_13, %c0_14], %29 {strides = array<i32>} : memref<2x4xf32, #tpu.memory_space<vmem>>, vector<2x4xf32>,
    return
  }
  func.func @transform_0(%arg0: i32) -> (i32, i32, i32) {
    %c0_i32 = arith.constant 0 : i32
    %c0_i32_0 = arith.constant 0 : i32
    %c0_i32_1 = arith.constant 0 : i32
    return %arg0, %c0_i32, %c0_i32_0 : i32, i32, i32
  }
  func.func @transform_1(%arg0: i32) -> (i32, i32) {
    %c0_i32 = arith.constant 0 : i32
    %c0_i32_0 = arith.constant 0 : i32
    %c0_i32_1 = arith.constant 0 : i32
    return %c0_i32, %c0_i32_0 : i32, i32
  }
  func.func @transform_2(%arg0: i32) -> (i32, i32) {
    %c0_i32 = arith.constant 0 : i32
    %c0_i32_0 = arith.constant 0 : i32
    %c0_i32_1 = arith.constant 0 : i32
    return %c0_i32, %c0_i32_0 : i32, i32
  }
  func.func @transform_3(%arg0: i32) -> (i32, i32) {
    %c0_i32 = arith.constant 0 : i32
    %c0_i32_0 = arith.constant 0 : i32
    %c0_i32_1 = arith.constant 0 : i32
    return %c0_i32, %c0_i32_0 : i32, i32
  }
  func.func @transform_4(%arg0: i32) -> (i32, i32) {
    %c0_i32 = arith.constant 0 : i32
    %c0_i32_0 = arith.constant 0 : i32
    %c0_i32_1 = arith.constant 0 : i32
    return %c0_i32, %c0_i32_0 : i32, i32
  }
  func.func @transform_5(%arg0: i32) -> (i32, i32) {
    %c0_i32 = arith.constant 0 : i32
    %c0_i32_0 = arith.constant 0 : i32
    return %arg0, %c0_i32 : i32, i32
  }
}

</mosaic_0001>

<bundles_post_ra>
// kernel: tpu_custom_call.1
= control target key start
LH: loop header
LB: loop body
LE: loop exit
PB: predicated region body
PF: predicated region fallthrough
CT: control target
= control target key end

     0   :  { %10 = vsyncpa [#allocation3], 0  ;;  %s574_s0 = inlined_call_operand.vmem [shape: f32[2,4,256], index: 0, kind: input, shape index: {}]   ;;  %s575_s1 = inlined_call_operand.hbm [shape: f32[256,128], index: 1, kind: input, shape index: {}]   ;;  %s576_s2 = inlined_call_operand.vmem [shape: f32[1,128], index: 2, kind: input, shape index: {}]   ;;  %s577_s3 = inlined_call_operand.vmem [shape: f32[128,4], index: 3, kind: input, shape index: {}]   ;;  %s578_s4 = inlined_call_operand.vmem [shape: f32[1,4], index: 4, kind: input, shape index: {}]   ;;  %s579_s5 = inlined_call_operand.hbm [shape: f32[2,4], index: 5, kind: output, shape index: {}]  }
   0x1   :  { %11 = vsyncpa [#allocation4], 0  ;;  %s453_s18 = smov [#allocation2]  }
   0x2   :  { %s19_s19 = sshll.u32 %s453_s18, 4  ;;  %s20_s19 = int_to_ptr.vmem [resolvable:$true] %s19_s19 }
   0x3   :  { %s417_s20 = scalar_lea.vmem %s20_s19, 4096  ;;  %p422_p1 = scmp.lt.s32.totalorder %s20_s19, %s20_s19 }
   0x4   :  { %p418_p0 = scmp.ne.s32.totalorder %s20_s19, %s417_s20  ;;  %p423_p2 = scmp.lt.s32.totalorder %s417_s20, %s417_s20 }
   0x6   :  { %p424_p3 = por %p423_p2, %p422_p1 }
   0x8   :  { %p425_p4 = pnand %p424_p3, %p418_p0 }
   0xa   :  { %428 = shalt.err (!%p425_p4)
}
   0xb   :  { %s454_s21 = smov 128   ;;  %s455_s22 = smov 8  }
   0xc   :  { %25 = dma.hbm_to_vmem [thread:$0]  %s575_s1, 4096, %s20_s19, [#allocation3], %s454_s21, %s454_s21, %s455_s22  }
   0xd   :  { %449 = dma.done.wait [#allocation3], 4096  }
   0xe   :  { %450 = vsyncadd [#allocation3], 4294963200  ;;  %v456_v0 = vmov 0.0   ;;  %v96_v1 = vld [vmem:[#allocation2 + $0xf8] sm:$0xff]  ;;  %v95_v3 = vld [vmem:[#allocation2 + $0xf0] sm:$0xff]  ;;  %v106_v13 = vlaneseq  ;;  %vm122_vm0 = vcmask 1041409  }
   0xf   :  { %368 = vmatprep.subr.mxu1 %v456_v0  ;;  %v80_v2 = vld [vmem:[#allocation2 + $0x78] sm:$0xff]  ;;  %316 = vmatprep.subr.mxu0 %v96_v1  ;;  %v79_v4 = vld [vmem:[#allocation2 + $0x70] sm:$0xff]  ;;  %v94_v5 = vld [vmem:[#allocation2 + $0xe8] sm:$0xff]  ;;  %vm457_vm1 = vmmov 0   ;;  %s458_s11 = smov [#allocation5]   ;;  %vm291_vm2 = vcmask 25600  }
  0x10   :  { %317 = vmatpush3.msra.mxu0 %v80_v2  ;;  %v78_v6 = vld [vmem:[#allocation2 + $0x68] sm:$0xff]  ;;  %v93_v7 = vld [vmem:[#allocation2 + $0xe0] sm:$0xff]  ;;  %v92_v9 = vld [vmem:[#allocation2 + $0xd8] sm:$0xff]  ;;  %v107_v28 = vshrl.u32 %v106_v13, 7  ;;  %400 = vmatprep.mubr.msk.f32.mxu1 %vm457_vm1, %v456_v0 }
  0x11   :  { %318 = vmatprep.subr.mxu0 %v95_v3  ;;  %v77_v8 = vld [vmem:[#allocation2 + $0x60] sm:$0xff]  ;;  %v76_v10 = vld [vmem:[#allocation2 + $0x58] sm:$0xff]  ;;  %v91_v11 = vld [vmem:[#allocation2 + $0xd0] sm:$0xff] }
  0x12   :  { %319 = vmatpush3.msra.mxu0 %v79_v4  ;;  %v75_v12 = vld [vmem:[#allocation2 + $0x50] sm:$0xff]  ;;  %v90_v14 = vld [vmem:[#allocation2 + $0xc8] sm:$0xff]  ;;  %v35_v16 = vld [vmem:[%s574_s0] sm:$0xff]  ;;  %v112_v40 = vsub.s32 4, %v107_v28  ;;  %v108_v54 = vsub.s32 0, %v107_v28 }
  0x13   :  { %320 = vmatprep.subr.mxu0 %v94_v5  ;;  %v74_v15 = vld [vmem:[#allocation2 + $0x48] sm:$0xff]  ;;  %v308_v18 = vrot.slane %v35_v16, 9  ;;  %v310_v19 = vrot.slane %v35_v16, 10  ;;  %v213_v20 = vld [vmem:[%s577_s3 + $0x78] sm:$0xff]  ;;  %v212_v21 = vld [vmem:[%s577_s3 + $0x70] sm:$0xff]  ;;  %v312_v27 = vrot.slane %v35_v16, 11 }
  0x14   :  { %321 = vmatpush3.msra.mxu0 %v78_v6  ;;  %v36_v17 = vld [vmem:[%s574_s0 + $0x8] sm:$0xff]  ;;  %v89_v22 = vld [vmem:[#allocation2 + $0xc0] sm:$0xff]  ;;  %369 = vmatpush3.msra.mxu1 %v213_v20  ;;  %v88_v30 = vld [vmem:[#allocation2 + $0xb8] sm:$0xff] }
  0x15   :  { %322 = vmatprep.subr.mxu0 %v93_v7  ;;  %v309_v23 = vrot.slane %v36_v17, 9  ;;  %v311_v24 = vrot.slane %v36_v17, 10  ;;  %v73_v25 = vld [vmem:[#allocation2 + $0x40] sm:$0xff]  ;;  %v45_v26 = vadd.f32 %v308_v18, %v35_v16  ;;  %370 = vmatprep.subr.mxu1 %v456_v0  ;;  %v211_v29 = vld [vmem:[%s577_s3 + $0x68] sm:$0xff]  ;;  %v313_v32 = vrot.slane %v36_v17, 11  ;;  %v72_v33 = vld [vmem:[#allocation2 + $0x38] sm:$0xff] }
  0x16   :  { %323 = vmatpush3.msra.mxu0 %v77_v8  ;;  %371 = vmatpush3.msra.mxu1 %v212_v21  ;;  %v210_v35 = vld [vmem:[%s577_s3 + $0x60] sm:$0xff]  ;;  %v87_v36 = vld [vmem:[#allocation2 + $0xb0] sm:$0xff]  ;;  %v209_v41 = vld [vmem:[%s577_s3 + $0x58] sm:$0xff] }
  0x17   :  { %324 = vmatprep.subr.mxu0 %v92_v9  ;;  %v46_v31 = vadd.f32 %v309_v23, %v36_v17  ;;  %v53_v34 = vadd.f32 %v310_v19, %v45_v26  ;;  %372 = vmatprep.subr.mxu1 %v456_v0  ;;  %v71_v38 = vld [vmem:[#allocation2 + $0x30] sm:$0xff]  ;;  %v86_v42 = vld [vmem:[#allocation2 + $0xa8] sm:$0xff]  ;;  %v85_v47 = vld [vmem:[#allocation2 + $0xa0] sm:$0xff] }
  0x18   :  { %325 = vmatpush3.msra.mxu0 %v76_v10  ;;  %373 = vmatpush3.msra.mxu1 %v211_v29  ;;  %v70_v44 = vld [vmem:[#allocation2 + $0x28] sm:$0xff]  ;;  %v208_v46 = vld [vmem:[%s577_s3 + $0x50] sm:$0xff]  ;;  %v69_v49 = vld [vmem:[#allocation2 + $0x20] sm:$0xff] }
  0x19   :  { %326 = vmatprep.subr.mxu0 %v91_v11  ;;  %v54_v37 = vadd.f32 %v311_v24, %v46_v31  ;;  %v61_v39 = vadd.f32 %v312_v27, %v53_v34  ;;  %374 = vmatprep.subr.mxu1 %v456_v0  ;;  %v207_v51 = vld [vmem:[%s577_s3 + $0x48] sm:$0xff]  ;;  %v84_v52 = vld [vmem:[#allocation2 + $0x98] sm:$0xff]  ;;  %v83_v56 = vld [vmem:[#allocation2 + $0x90] sm:$0xff] }
  0x1a   :  { %327 = vmatpush3.msra.mxu0 %v75_v12  ;;  %375 = vmatpush3.msra.mxu1 %v210_v35  ;;  %v68_v55 = vld [vmem:[#allocation2 + $0x18] sm:$0xff]  ;;  %v206_v58 = vld [vmem:[%s577_s3 + $0x40] sm:$0xff]  ;;  %v67_v59 = vld [vmem:[#allocation2 + $0x10] sm:$0xff] }
  0x1b   :  { %328 = vmatprep.subr.mxu0 %v90_v14  ;;  %v62_v43 = vadd.f32 %v313_v32, %v54_v37  ;;  %v63_v45 = vmul.f32 0.25, %v61_v39  ;;  %376 = vmatprep.subr.mxu1 %v456_v0  ;;  %v82_v60 = vld [vmem:[#allocation2 + $0x88] sm:$0xff]  ;;  %v205_v63 = vld [vmem:[%s577_s3 + $0x38] sm:$0xff]  ;;  %v81_v2 = vld [vmem:[#allocation2 + $0x80] sm:$0xff] }
  0x1c   :  { %329 = vmatpush3.msra.mxu0 %v74_v15  ;;  %377 = vmatpush3.msra.mxu1 %v209_v41  ;;  %v66_v1 = vld [vmem:[#allocation2 + $0x8] sm:$0xff]  ;;  %v204_v3 = vld [vmem:[%s577_s3 + $0x30] sm:$0xff]  ;;  %v65_v4 = vld [vmem:[#allocation2] sm:$0xff] }
  0x1d   :  { %330 = vmatprep.subr.mxu0 %v89_v22  ;;  %v64_v48 = vmul.f32 0.25, %v62_v43  ;;  %v113_v50 = vrot.slane %v63_v45, %v112_v40  ;;  %378 = vmatprep.subr.mxu1 %v456_v0  ;;  %v109_v61 = vrot.slane %v63_v45, %v108_v54  ;;  %v203_v6 = vld [vmem:[%s577_s3 + $0x28] sm:$0xff]  ;;  %v202_v7 = vld [vmem:[%s577_s3 + $0x20] sm:$0xff]  ;;  %v201_v8 = vld [vmem:[%s577_s3 + $0x18] sm:$0xff] }
  0x1e   :  { %331 = vmatpush3.msra.mxu0 %v73_v25  ;;  %379 = vmatpush3.msra.mxu1 %v208_v46  ;;  %v200_v9 = vld [vmem:[%s577_s3 + $0x10] sm:$0xff]  ;;  %v199_v10 = vld [vmem:[%s577_s3 + $0x8] sm:$0xff]  ;;  %v198_v11 = vld [vmem:[%s577_s3] sm:$0xff]  ;;  %s299_s3 = sshll.u32 %s458_s11, 4  ;;  %s300_s3 = int_to_ptr.vmem [resolvable:$true] %s299_s3 }
  0x1f   :  { %332 = vmatprep.subr.mxu0 %v88_v30  ;;  %v121_v53 = vrot.slane %v64_v48, %v112_v40  ;;  %380 = vmatprep.subr.mxu1 %v456_v0  ;;  %v117_v62 = vrot.slane %v64_v48, %v108_v54  ;;  %v314_v13 = vld [vmem:[%s576_s2] ss:$0 sm:$0xff]  ;;  %s429_s12 = scalar_lea.vmem %s300_s3, 32  ;;  %p434_p6 = scmp.lt.s32.totalorder %s300_s3, %s300_s3 }
  0x20   :  { %333 = vmatpush3.msra.mxu0 %v72_v33  ;;  %381 = vmatpush3.msra.mxu1 %v207_v51  ;;  %v315_v18 = vld [vmem:[%s578_s4] ss:$0 sm:$0xff]  ;;  %p430_p5 = scmp.ne.s32.totalorder %s300_s3, %s429_s12  ;;  %p435_p7 = scmp.lt.s32.totalorder %s429_s12, %s429_s12 }
  0x21   :  { %334 = vmatprep.subr.mxu0 %v87_v36  ;;  %v124_v57 = vsel %vm122_vm0, %v121_v53, %v113_v50  ;;  %382 = vmatprep.subr.mxu1 %v456_v0  ;;  %v123_v5 = vsel %vm122_vm0, %v117_v62, %v109_v61 }
  0x22   :  { %335 = vmatpush3.msra.mxu0 %v71_v38  ;;  %191 = vmatprep.mubr.f32.mxu0 %v124_v57  ;;  %p436_p8 = por %p435_p7, %p434_p6 }
  0x23   :  { %336 = vmatprep.subr.mxu0 %v86_v42  ;;  %383 = vmatpush3.msra.mxu1 %v206_v58 }
  0x24   :  { %337 = vmatpush3.msra.mxu0 %v70_v44  ;;  %384 = vmatprep.subr.mxu1 %v456_v0  ;;  %p437_p9 = pnand %p436_p8, %p430_p5 }
  0x25   :  { %338 = vmatprep.subr.mxu0 %v85_v47  ;;  %385 = vmatpush3.msra.mxu1 %v205_v63 }
  0x26   :  { %339 = vmatpush3.msra.mxu0 %v69_v49  ;;  %386 = vmatprep.subr.mxu1 %v456_v0 }
  0x27   :  { %340 = vmatprep.subr.mxu0 %v84_v52  ;;  %387 = vmatpush3.msra.mxu1 %v204_v3 }
  0x28   :  { %341 = vmatpush3.msra.mxu0 %v68_v55  ;;  %388 = vmatprep.subr.mxu1 %v456_v0 }
  0x29   :  { %342 = vmatprep.subr.mxu0 %v83_v56  ;;  %389 = vmatpush3.msra.mxu1 %v203_v6 }
  0x2a   :  { %343 = vmatpush3.msra.mxu0 %v67_v59  ;;  %390 = vmatprep.subr.mxu1 %v456_v0 }
  0x2b   :  { %344 = vmatprep.subr.mxu0 %v82_v60  ;;  %391 = vmatpush3.msra.mxu1 %v202_v7 }
  0x2c   :  { %345 = vmatpush3.msra.mxu0 %v66_v1  ;;  %392 = vmatprep.subr.mxu1 %v456_v0 }
  0x2d   :  { %346 = vmatprep.subr.mxu0 %v81_v2  ;;  %393 = vmatpush3.msra.mxu1 %v201_v8 }
  0x2e   :  { %347 = vmatpush3.msra.mxu0 %v65_v4  ;;  %394 = vmatprep.subr.mxu1 %v456_v0 }
  0x2f   :  { %192 = vmatmul.mubr.f32.vlgmr.msra.gmra.mxu0 %v123_v5  ;;  %395 = vmatpush3.msra.mxu1 %v200_v9 }
  0x30   :  { %396 = vmatprep.subr.mxu1 %v456_v0 }
  0x31   :  { %397 = vmatpush3.msra.mxu1 %v199_v10 }
  0x32   :  { %398 = vmatprep.subr.mxu1 %v456_v0 }
  0x33   :  { %399 = vmatpush3.msra.mxu1 %v198_v11 }
  0xef   :  { %v348_v12 = vpop.f32.mrf.mxu0 }
  0xf1   :  { %v349_v14 = vpop.f32.mrf.mxu0 }
  0xf2   :  { %v350_v15 = vadd.f32 %v349_v14, %v348_v12 }
  0xf4   :  { %v194_v16 = vadd.f32 %v350_v15, %v314_v13 }
  0xf6   :  { %v197_v17 = vmax.f32 %v194_v16, 0.0 }
  0xf8   :  { %401 = vmatmul.mubr.f32.vlgmr.msra.gmra.mxu1 %v197_v17 }
 0x1b8   :  { %v287_v19 = vpop.f32.mrf.mxu1 }
 0x1b9   :  { %v288_v20 = vadd.f32 %v315_v18, %v287_v19 }
 0x1ba   :  { %v402_v0 = vpop.f32.mrf.mxu1 }
 0x1bb   :  { %292 = vst.msk [vmem:[#allocation5] sm:$0x3] %vm291_vm2, %v288_v20 }
 0x1bc   :  { %440 = shalt.err (!%p437_p9)
}
 0x1bd   :  { %302 = dma.vmem_to_hbm [thread:$0]  %s300_s3, 32, %s579_s5, [#allocation4]  }
 0x1be   :  { %451 = dma.done.wait [#allocation4], 32  }
 0x1bf   :  { %452 = vsyncadd [#allocation4], 4294967264 }
 0x1c0   :  { %306 = vsyncpa [#allocation3], 1 }
 0x1c1   :  { %307 = vsyncpa [#allocation4], 1 }

</bundles_post_ra>
